<compile_context>
chip_gen: v7x
topology: tpu7x:2x2x1
jax: 0.10.0
libtpu: 0.0.40
codegen_flags: <defaults>
</compile_context>

<pallas_src>
import functools

import jax
import jax.numpy as jnp
from jax.experimental import pallas as pl
from jax.experimental.pallas import tpu as pltpu

LN_EPS = 1e-5  # PyTorch nn.LayerNorm default


def _round_up(n, m):
    return ((n + m - 1) // m) * m


def _cdiv(a, b):
    return -(-a // b)


def _vmem_capacity_bytes():
    """Physical per-core VMEM; conservative 64 MiB (v7x-class) if the query fails."""
    try:
        return int(pltpu.get_tpu_info().vmem_capacity_bytes)
    except Exception:
        return 64 << 20


def _default_block_b(Hp, cap):
    """Device/shape-conditional batch-tile target that keeps both weights resident."""
    scoped = min((cap * 3) // 4, 96 << 20)
    weights = 2 * Hp * Hp * 2                 # both bf16 weight matrices resident
    budget = scoped - weights - (6 << 20)     # headroom for vecs + compiler scratch
    per_row = 12 * Hp * 4                     # x/out double-buffered + ~4 f32 temporaries
    fit = max(8, (budget // per_row) // 8 * 8) if budget > 0 else 8
    if cap >= (96 << 20):                     # v5e / v6e class (128 MiB VMEM)
        target = 512
    else:                                     # v7x class (64 MiB per-core VMEM)
        target = 256 if Hp <= 1024 else 128
    return int(max(8, min(target, fit)))


def _vmem_limit_bytes(bb, Hp, cap, single_buffer):
    """Explicit scoped-VMEM request sized from the real footprint, with headroom."""
    nbuf = 1 if single_buffer else 2
    wbuf = nbuf * 2 * Hp * Hp * 2             # weights (bf16)
    vec = nbuf * 8 * Hp * 4                   # packed vectors
    act = 4 * bb * Hp * 4                     # x + out, double-buffered, f32
    tmp = 6 * bb * Hp * 4 + (4 << 20)         # h1/r/h2/ln2 temporaries + Mosaic scratch
    need = wbuf + vec + act + tmp
    hard = min((cap * 3) // 4, 96 << 20)      # never request full VMEM (v7x = 64 MiB)
    return int(min(max(need, 16 << 20), hard))


def bronet_block_kernel(x_ref, w1_ref, w2_ref, vecs_ref, o_ref, *, true_h, num_subtiles):
    """out = x + LN2(W2 @ ReLU(LN1(W1 @ x + b1)) + b2), lane-padded to Hp."""
    bb, Hp = x_ref.shape
    sub = bb // num_subtiles

    # Packed per-feature vectors: rows = [b1, g1, be1, b2, g2, be2, 0, 0].
    vecs = vecs_ref[...]
    b1, g1, be1 = vecs[0:1, :], vecs[1:2, :], vecs[2:3, :]
    b2, g2, be2 = vecs[3:4, :], vecs[4:5, :], vecs[5:6, :]

    w1 = w1_ref[...]
    w2 = w2_ref[...]

    # Lane mask for the zero-padded feature lanes (only needed when Hp > true_h).
    if Hp > true_h:
        lane = jax.lax.broadcasted_iota(jnp.int32, (1, Hp), 1)
        mask = lane < true_h
    else:
        mask = None

    inv_n = 1.0 / float(true_h)

    def layernorm(h, gamma, beta):
        # Two-pass LayerNorm (matches PyTorch): padded lanes of h are exactly zero,
        # so the sum over all Hp lanes equals the sum over the true_h real lanes.
        mu = jnp.sum(h, axis=-1, keepdims=True) * inv_n
        hc = h - mu
        if mask is not None:
            hc = jnp.where(mask, hc, 0.0)     # keep padded lanes out of the variance
        var = jnp.sum(hc * hc, axis=-1, keepdims=True) * inv_n
        return hc * jax.lax.rsqrt(var + LN_EPS) * gamma + beta

    # Process the batch tile as `num_subtiles` independent row groups in one basic
    # block: sub-tile t+1's MXU matmul interleaves with sub-tile t's LN (VPU/XLU/EUP).
    for t in range(num_subtiles):
        r0 = t * sub
        x = x_ref[r0:r0 + sub, :]             # f32 rows (static slice, zero cost)
        h1 = jnp.dot(x.astype(jnp.bfloat16), w1,
                     preferred_element_type=jnp.float32) + b1
        r = jnp.maximum(layernorm(h1, g1, be1), 0.0)
        h2 = jnp.dot(r.astype(jnp.bfloat16), w2,
                     preferred_element_type=jnp.float32) + b2
        o_ref[r0:r0 + sub, :] = (x + layernorm(h2, g2, be2)).astype(o_ref.dtype)


@functools.partial(
    jax.jit,
    static_argnames=("true_h", "bb", "bp", "num_subtiles", "vmem_limit", "single_buffer"),
)
def _bronet_call(x, w1_t, w2_t, vecs, *, true_h, bb, bp, num_subtiles,
                 vmem_limit, single_buffer):
    B, H = x.shape
    Hp = w1_t.shape[0]

    xp = x
    if bp != B or Hp != H:
        xp = jnp.pad(x, ((0, bp - B), (0, Hp - H)))

    grid = (bp // bb,)
    row_spec = pl.BlockSpec((bb, Hp), lambda i: (i, 0))
    if single_buffer:
        # Constant block index across the grid -> one buffer is enough (saves VMEM).
        mat_spec = pl.BlockSpec((Hp, Hp), lambda i: (0, 0), pipeline_mode=pl.Buffered(1))
        vec_spec = pl.BlockSpec((8, Hp), lambda i: (0, 0), pipeline_mode=pl.Buffered(1))
    else:
        mat_spec = pl.BlockSpec((Hp, Hp), lambda i: (0, 0))
        vec_spec = pl.BlockSpec((8, Hp), lambda i: (0, 0))

    cost = pl.CostEstimate(
        flops=2 * 2 * bp * Hp * Hp,
        transcendentals=2 * bp,
        bytes_accessed=2 * bp * Hp * 4 + 2 * Hp * Hp * 2 + 8 * Hp * 4,
    )

    out = pl.pallas_call(
        functools.partial(bronet_block_kernel, true_h=true_h, num_subtiles=num_subtiles),
        out_shape=jax.ShapeDtypeStruct((bp, Hp), x.dtype),
        grid=grid,
        in_specs=[row_spec, mat_spec, mat_spec, vec_spec],
        out_specs=row_spec,
        compiler_params=pltpu.CompilerParams(
            dimension_semantics=("parallel",),
            vmem_limit_bytes=vmem_limit,
        ),
        cost_estimate=cost,
    )(xp, w1_t, w2_t, vecs)

    return out[:B, :H]


def bronet_block(x, prepped, block_b=None):
    """x: (B, H) float32.  prepped: output of prepare_params() (padded/packed once)."""
    B, H = x.shape
    true_h = prepped["hidden_size"]
    assert H == true_h, (H, true_h)
    Hp = prepped["w1_t"].shape[0]

    cap = _vmem_capacity_bytes()
    if block_b is None:
        block_b = _default_block_b(Hp, cap)

    # Adaptive batch tile: minimize last-step padding waste (e.g. B=300, block_b=256
    # gives bb=160 / 20 padded rows instead of bb=256 / 212 padded rows).
    nblk = max(1, _cdiv(B, block_b))
    rows = _cdiv(B, nblk)
    bb = _round_up(rows, 16) if rows >= 32 else _round_up(rows, 8)
    bp = bb * nblk
    num_subtiles = 2 if bb >= 32 else 1       # bb >= 32 is always a multiple of 16

    args = (x, prepped["w1_t"], prepped["w2_t"], prepped["vecs"])
    kwargs = dict(true_h=true_h, bb=bb, bp=bp, num_subtiles=num_subtiles)
    try:
        return _bronet_call(*args, single_buffer=True,
                            vmem_limit=_vmem_limit_bytes(bb, Hp, cap, True), **kwargs)
    except Exception:
        # Fallback if this JAX version rejects pipeline_mode=pl.Buffered(1).
        return _bronet_call(*args, single_buffer=False,
                            vmem_limit=_vmem_limit_bytes(bb, Hp, cap, False), **kwargs)


def orthogonal_init(key, shape, gain=1.0):
    """Deterministic orthogonal init (matches torch.nn.init.orthogonal_ semantics)."""
    rows, cols = shape
    n = max(rows, cols)
    a = jax.random.normal(key, (n, n), dtype=jnp.float32)
    q, r = jnp.linalg.qr(a)
    q = q * jnp.sign(jnp.diag(r))[None, :]
    return gain * q[:rows, :cols]


def make_params(hidden_size, key):
    """Raw (unpadded) parameters. PyTorch Linear weight is (out,in); store transpose."""
    k1, k2 = jax.random.split(key)
    w1 = orthogonal_init(k1, (hidden_size, hidden_size))
    w2 = orthogonal_init(k2, (hidden_size, hidden_size))
    zeros = jnp.zeros((1, hidden_size), jnp.float32)
    ones = jnp.ones((1, hidden_size), jnp.float32)
    return {"w1_t": w1.T, "b1": zeros, "g1": ones, "be1": zeros,
            "w2_t": w2.T, "b2": zeros, "g2": ones, "be2": zeros}


def prepare_params(params):
    """One-time padding/packing (hoisted out of the per-call path).

    Returns lane-padded bf16 weights and a single packed (8, Hp) f32 vector array
    with rows [b1, g1, be1, b2, g2, be2, 0, 0]; padded gamma/beta lanes are zero so
    LayerNorm over the true hidden size stays exact.
    """
    H = params["w1_t"].shape[0]
    Hp = _round_up(H, 128)

    def pad_w(w):
        return jnp.pad(w, ((0, Hp - H), (0, Hp - H))).astype(jnp.bfloat16)

    def pad_v(v):
        v = jnp.asarray(v, jnp.float32).reshape(-1)
        return jnp.pad(v, (0, Hp - v.shape[0]))

    vec_rows = [pad_v(params[k]) for k in ("b1", "g1", "be1", "b2", "g2", "be2")]
    vec_rows += [jnp.zeros((Hp,), jnp.float32)] * 2
    return {
        "w1_t": pad_w(params["w1_t"]),
        "w2_t": pad_w(params["w2_t"]),
        "vecs": jnp.stack(vec_rows, axis=0),
        "hidden_size": H,
    }


def reference(x, params):
    """Pure-JAX reference mirroring the kernel's precision (bf16 matmul, f32 rest)."""
    def ln(h, g, b):
        mu = jnp.mean(h, axis=-1, keepdims=True)
        var = jnp.mean((h - mu) ** 2, axis=-1, keepdims=True)
        return (h - mu) * jax.lax.rsqrt(var + LN_EPS) * g + b

    w1 = params["w1_t"].astype(jnp.bfloat16)
    w2 = params["w2_t"].astype(jnp.bfloat16)
    h1 = jnp.dot(x.astype(jnp.bfloat16), w1,
                 preferred_element_type=jnp.float32) + params["b1"]
    r = jnp.maximum(ln(h1, params["g1"], params["be1"]), 0.0)
    h2 = jnp.dot(r.astype(jnp.bfloat16), w2,
                 preferred_element_type=jnp.float32) + params["b2"]
    return x + ln(h2, params["g2"], params["be2"])


if __name__ == "__main__":
    hidden_size = 32
    batch = 8

    key = jax.random.PRNGKey(0)
    kx, kp = jax.random.split(key)
    x = jax.random.normal(kx, (batch, hidden_size), dtype=jnp.float32)

    params = make_params(hidden_size, kp)
    prepped = prepare_params(params)   # one-time prep: weights padded/packed off the hot path

    out = jax.block_until_ready(bronet_block(x, prepped))
    ref = reference(x, params)

    assert out.shape == x.shape and out.dtype == x.dtype
    assert jnp.allclose(out, ref, atol=1e-3, rtol=1e-3), \
        float(jnp.max(jnp.abs(out - ref)))

    print("KERNEL_OK")
</pallas_src>

<mosaic_0001>
module attributes {stable_mosaic.version = 11 : i64} {
  func.func @bronet_block_kernel(%arg0: i32, %arg1: memref<8x128xf32, #tpu.memory_space<vmem>>, %arg2: memref<128x128xbf16, #tpu.memory_space<vmem>>, %arg3: memref<128x128xbf16, #tpu.memory_space<vmem>>, %arg4: memref<8x128xf32, #tpu.memory_space<vmem>>, %arg5: memref<8x128xf32, #tpu.memory_space<vmem>>) attributes {dimension_semantics = [#tpu.dimension_semantics<parallel>], iteration_bounds = array<i64: 1>, scalar_prefetch = 0 : i64, scratch_operands = 0 : i64, tpu.core_type = #tpu.core_type<tc>, window_params = [{transform_indices = @transform_0, window_bounds = array<i64: 8, 128>}, {pipeline_mode = #tpu.pipeline_mode<synchronous>, transform_indices = @transform_1, window_bounds = array<i64: 128, 128>}, {pipeline_mode = #tpu.pipeline_mode<synchronous>, transform_indices = @transform_2, window_bounds = array<i64: 128, 128>}, {pipeline_mode = #tpu.pipeline_mode<synchronous>, transform_indices = @transform_3, window_bounds = array<i64: 8, 128>}, {transform_indices = @transform_4, window_bounds = array<i64: 8, 128>}]} {
    %c0 = arith.constant 0 : index
    %c0_0 = arith.constant 0 : index
    %0 = vector.load %arg4[%c0, %c0_0] : memref<8x128xf32, #tpu.memory_space<vmem>>, vector<8x128xf32>
    %1 = vector.extract_strided_slice %0 {offsets = [0, 0], sizes = [1, 128], strides = [1, 1]} : vector<8x128xf32> to vector<1x128xf32>
    %2 = vector.extract_strided_slice %0 {offsets = [1, 0], sizes = [1, 128], strides = [1, 1]} : vector<8x128xf32> to vector<1x128xf32>
    %3 = vector.extract_strided_slice %0 {offsets = [2, 0], sizes = [1, 128], strides = [1, 1]} : vector<8x128xf32> to vector<1x128xf32>
    %4 = vector.extract_strided_slice %0 {offsets = [3, 0], sizes = [1, 128], strides = [1, 1]} : vector<8x128xf32> to vector<1x128xf32>
    %5 = vector.extract_strided_slice %0 {offsets = [4, 0], sizes = [1, 128], strides = [1, 1]} : vector<8x128xf32> to vector<1x128xf32>
    %6 = vector.extract_strided_slice %0 {offsets = [5, 0], sizes = [1, 128], strides = [1, 1]} : vector<8x128xf32> to vector<1x128xf32>
    %c0_1 = arith.constant 0 : index
    %c0_2 = arith.constant 0 : index
    %7 = vector.load %arg2[%c0_1, %c0_2] : memref<128x128xbf16, #tpu.memory_space<vmem>>, vector<128x128xbf16>
    %c0_3 = arith.constant 0 : index
    %c0_4 = arith.constant 0 : index
    %8 = vector.load %arg3[%c0_3, %c0_4] : memref<128x128xbf16, #tpu.memory_space<vmem>>, vector<128x128xbf16>
    %9 = tpu.iota {dimensions = array<i32: 1>} : vector<1x128xi32>
    %c32_i32 = arith.constant 32 : i32
    %10 = vector.broadcast %c32_i32 : i32 to vector<1x128xi32>
    %11 = arith.cmpi slt, %9, %10 : vector<1x128xi32>
    %c0_5 = arith.constant 0 : index
    %c0_6 = arith.constant 0 : index
    %12 = vector.load %arg1[%c0_5, %c0_6] : memref<8x128xf32, #tpu.memory_space<vmem>>, vector<8x128xf32>
    %13 = arith.truncf %12 : vector<8x128xf32> to vector<8x128xbf16>
    %cst = arith.constant dense<0.000000e+00> : vector<8x128xf32>
    %14 = tpu.matmul %13, %7, %cst {dimension_numbers = #tpu.dot_dimension_numbers<[1], [0], [0], [1], [0, 0, 1, 1], [], []>} : vector<8x128xbf16>, vector<128x128xbf16>, vector<8x128xf32> -> vector<8x128xf32>
    %15 = vector.broadcast %1 : vector<1x128xf32> to vector<8x128xf32>
    %16 = arith.addf %14, %15 : vector<8x128xf32>
    %cst_7 = arith.constant dense<0.000000e+00> : vector<8xf32>
    %17 = vector.multi_reduction <add>, %16, %cst_7 [1] : vector<8x128xf32> to vector<8xf32>
    %18 = vector.shape_cast %17 : vector<8xf32> to vector<8x1xf32>
    %cst_8 = arith.constant 3.125000e-02 : f32
    %19 = vector.broadcast %cst_8 : f32 to vector<8x1xf32>
    %20 = arith.mulf %18, %19 : vector<8x1xf32>
    %21 = vector.broadcast %20 : vector<8x1xf32> to vector<8x128xf32>
    %22 = arith.subf %16, %21 : vector<8x128xf32>
    %cst_9 = arith.constant 0.000000e+00 : f32
    %23 = vector.shape_cast %11 : vector<1x128xi1> to vector<1x128xi1>
    %24 = vector.broadcast %23 : vector<1x128xi1> to vector<8x128xi1>
    %25 = vector.broadcast %cst_9 : f32 to vector<8x128xf32>
    %26 = arith.select %24, %22, %25 : vector<8x128xi1>, vector<8x128xf32>
    %27 = arith.mulf %26, %26 : vector<8x128xf32>
    %cst_10 = arith.constant dense<0.000000e+00> : vector<8xf32>
    %28 = vector.multi_reduction <add>, %27, %cst_10 [1] : vector<8x128xf32> to vector<8xf32>
    %29 = vector.shape_cast %28 : vector<8xf32> to vector<8x1xf32>
    %cst_11 = arith.constant 3.125000e-02 : f32
    %30 = vector.broadcast %cst_11 : f32 to vector<8x1xf32>
    %31 = arith.mulf %29, %30 : vector<8x1xf32>
    %cst_12 = arith.constant 9.99999974E-6 : f32
    %32 = vector.broadcast %cst_12 : f32 to vector<8x1xf32>
    %33 = arith.addf %31, %32 : vector<8x1xf32>
    %34 = math.rsqrt %33 : vector<8x1xf32>
    %35 = vector.broadcast %34 : vector<8x1xf32> to vector<8x128xf32>
    %36 = arith.mulf %26, %35 : vector<8x128xf32>
    %37 = vector.broadcast %2 : vector<1x128xf32> to vector<8x128xf32>
    %38 = arith.mulf %36, %37 : vector<8x128xf32>
    %39 = vector.broadcast %3 : vector<1x128xf32> to vector<8x128xf32>
    %40 = arith.addf %38, %39 : vector<8x128xf32>
    %cst_13 = arith.constant 0.000000e+00 : f32
    %41 = vector.broadcast %cst_13 : f32 to vector<8x128xf32>
    %42 = arith.maximumf %40, %41 : vector<8x128xf32>
    %43 = arith.truncf %42 : vector<8x128xf32> to vector<8x128xbf16>
    %cst_14 = arith.constant dense<0.000000e+00> : vector<8x128xf32>
    %44 = tpu.matmul %43, %8, %cst_14 {dimension_numbers = #tpu.dot_dimension_numbers<[1], [0], [0], [1], [0, 0, 1, 1], [], []>} : vector<8x128xbf16>, vector<128x128xbf16>, vector<8x128xf32> -> vector<8x128xf32>
    %45 = vector.broadcast %4 : vector<1x128xf32> to vector<8x128xf32>
    %46 = arith.addf %44, %45 : vector<8x128xf32>
    %cst_15 = arith.constant dense<0.000000e+00> : vector<8xf32>
    %47 = vector.multi_reduction <add>, %46, %cst_15 [1] : vector<8x128xf32> to vector<8xf32>
    %48 = vector.shape_cast %47 : vector<8xf32> to vector<8x1xf32>
    %cst_16 = arith.constant 3.125000e-02 : f32
    %49 = vector.broadcast %cst_16 : f32 to vector<8x1xf32>
    %50 = arith.mulf %48, %49 : vector<8x1xf32>
    %51 = vector.broadcast %50 : vector<8x1xf32> to vector<8x128xf32>
    %52 = arith.subf %46, %51 : vector<8x128xf32>
    %cst_17 = arith.constant 0.000000e+00 : f32
    %53 = vector.shape_cast %11 : vector<1x128xi1> to vector<1x128xi1>
    %54 = vector.broadcast %53 : vector<1x128xi1> to vector<8x128xi1>
    %55 = vector.broadcast %cst_17 : f32 to vector<8x128xf32>
    %56 = arith.select %54, %52, %55 : vector<8x128xi1>, vector<8x128xf32>
    %57 = arith.mulf %56, %56 : vector<8x128xf32>
    %cst_18 = arith.constant dense<0.000000e+00> : vector<8xf32>
    %58 = vector.multi_reduction <add>, %57, %cst_18 [1] : vector<8x128xf32> to vector<8xf32>
    %59 = vector.shape_cast %58 : vector<8xf32> to vector<8x1xf32>
    %cst_19 = arith.constant 3.125000e-02 : f32
    %60 = vector.broadcast %cst_19 : f32 to vector<8x1xf32>
    %61 = arith.mulf %59, %60 : vector<8x1xf32>
    %cst_20 = arith.constant 9.99999974E-6 : f32
    %62 = vector.broadcast %cst_20 : f32 to vector<8x1xf32>
    %63 = arith.addf %61, %62 : vector<8x1xf32>
    %64 = math.rsqrt %63 : vector<8x1xf32>
    %65 = vector.broadcast %64 : vector<8x1xf32> to vector<8x128xf32>
    %66 = arith.mulf %56, %65 : vector<8x128xf32>
    %67 = vector.broadcast %5 : vector<1x128xf32> to vector<8x128xf32>
    %68 = arith.mulf %66, %67 : vector<8x128xf32>
    %69 = vector.broadcast %6 : vector<1x128xf32> to vector<8x128xf32>
    %70 = arith.addf %68, %69 : vector<8x128xf32>
    %71 = arith.addf %12, %70 : vector<8x128xf32>
    %c0_21 = arith.constant 0 : index
    %c0_22 = arith.constant 0 : index
    %72 = vector.load %arg5[%c0_21, %c0_22] : memref<8x128xf32, #tpu.memory_space<vmem>>, vector<8x128xf32>
    tpu.vector_store %arg5[%c0_21, %c0_22], %71 {strides = array<i32>} : memref<8x128xf32, #tpu.memory_space<vmem>>, vector<8x128xf32>,
    return
  }
  func.func @transform_0(%arg0: i32) -> (i32, i32) {
    %c0_i32 = arith.constant 0 : i32
    %c0_i32_0 = arith.constant 0 : i32
    return %arg0, %c0_i32 : i32, i32
  }
  func.func @transform_1(%arg0: i32) -> (i32, i32) {
    %c0_i32 = arith.constant 0 : i32
    %c0_i32_0 = arith.constant 0 : i32
    %c0_i32_1 = arith.constant 0 : i32
    return %c0_i32, %c0_i32_0 : i32, i32
  }
  func.func @transform_2(%arg0: i32) -> (i32, i32) {
    %c0_i32 = arith.constant 0 : i32
    %c0_i32_0 = arith.constant 0 : i32
    %c0_i32_1 = arith.constant 0 : i32
    return %c0_i32, %c0_i32_0 : i32, i32
  }
  func.func @transform_3(%arg0: i32) -> (i32, i32) {
    %c0_i32 = arith.constant 0 : i32
    %c0_i32_0 = arith.constant 0 : i32
    %c0_i32_1 = arith.constant 0 : i32
    return %c0_i32, %c0_i32_0 : i32, i32
  }
  func.func @transform_4(%arg0: i32) -> (i32, i32) {
    %c0_i32 = arith.constant 0 : i32
    %c0_i32_0 = arith.constant 0 : i32
    return %arg0, %c0_i32 : i32, i32
  }
}

module attributes {stable_mosaic.version = 11 : i64} {
  func.func @bronet_block_kernel(%arg0: i32, %arg1: memref<8x128xf32, #tpu.memory_space<vmem>>, %arg2: memref<128x128xbf16, #tpu.memory_space<vmem>>, %arg3: memref<128x128xbf16, #tpu.memory_space<vmem>>, %arg4: memref<8x128xf32, #tpu.memory_space<vmem>>, %arg5: memref<8x128xf32, #tpu.memory_space<vmem>>) attributes {dimension_semantics = [#tpu.dimension_semantics<parallel>], iteration_bounds = array<i64: 1>, scalar_prefetch = 0 : i64, scratch_operands = 0 : i64, tpu.core_type = #tpu.core_type<tc>, window_params = [{transform_indices = @transform_0, window_bounds = array<i64: 8, 128>}, {pipeline_mode = #tpu.pipeline_mode<synchronous>, transform_indices = @transform_1, window_bounds = array<i64: 128, 128>}, {pipeline_mode = #tpu.pipeline_mode<synchronous>, transform_indices = @transform_2, window_bounds = array<i64: 128, 128>}, {pipeline_mode = #tpu.pipeline_mode<synchronous>, transform_indices = @transform_3, window_bounds = array<i64: 8, 128>}, {transform_indices = @transform_4, window_bounds = array<i64: 8, 128>}]} {
    %c0 = arith.constant 0 : index
    %c0_0 = arith.constant 0 : index
    %0 = vector.load %arg4[%c0, %c0_0] : memref<8x128xf32, #tpu.memory_space<vmem>>, vector<8x128xf32>
    %1 = vector.extract_strided_slice %0 {offsets = [0, 0], sizes = [1, 128], strides = [1, 1]} : vector<8x128xf32> to vector<1x128xf32>
    %2 = vector.extract_strided_slice %0 {offsets = [1, 0], sizes = [1, 128], strides = [1, 1]} : vector<8x128xf32> to vector<1x128xf32>
    %3 = vector.extract_strided_slice %0 {offsets = [2, 0], sizes = [1, 128], strides = [1, 1]} : vector<8x128xf32> to vector<1x128xf32>
    %4 = vector.extract_strided_slice %0 {offsets = [3, 0], sizes = [1, 128], strides = [1, 1]} : vector<8x128xf32> to vector<1x128xf32>
    %5 = vector.extract_strided_slice %0 {offsets = [4, 0], sizes = [1, 128], strides = [1, 1]} : vector<8x128xf32> to vector<1x128xf32>
    %6 = vector.extract_strided_slice %0 {offsets = [5, 0], sizes = [1, 128], strides = [1, 1]} : vector<8x128xf32> to vector<1x128xf32>
    %c0_1 = arith.constant 0 : index
    %c0_2 = arith.constant 0 : index
    %7 = vector.load %arg2[%c0_1, %c0_2] : memref<128x128xbf16, #tpu.memory_space<vmem>>, vector<128x128xbf16>
    %c0_3 = arith.constant 0 : index
    %c0_4 = arith.constant 0 : index
    %8 = vector.load %arg3[%c0_3, %c0_4] : memref<128x128xbf16, #tpu.memory_space<vmem>>, vector<128x128xbf16>
    %9 = tpu.iota {dimensions = array<i32: 1>} : vector<1x128xi32>
    %c32_i32 = arith.constant 32 : i32
    %10 = vector.broadcast %c32_i32 : i32 to vector<1x128xi32>
    %11 = arith.cmpi slt, %9, %10 : vector<1x128xi32>
    %c0_5 = arith.constant 0 : index
    %c0_6 = arith.constant 0 : index
    %12 = vector.load %arg1[%c0_5, %c0_6] : memref<8x128xf32, #tpu.memory_space<vmem>>, vector<8x128xf32>
    %13 = arith.truncf %12 : vector<8x128xf32> to vector<8x128xbf16>
    %cst = arith.constant dense<0.000000e+00> : vector<8x128xf32>
    %14 = tpu.matmul %13, %7, %cst {dimension_numbers = #tpu.dot_dimension_numbers<[1], [0], [0], [1], [0, 0, 1, 1], [], []>} : vector<8x128xbf16>, vector<128x128xbf16>, vector<8x128xf32> -> vector<8x128xf32>
    %15 = vector.broadcast %1 : vector<1x128xf32> to vector<8x128xf32>
    %16 = arith.addf %14, %15 : vector<8x128xf32>
    %cst_7 = arith.constant dense<0.000000e+00> : vector<8xf32>
    %17 = vector.multi_reduction <add>, %16, %cst_7 [1] : vector<8x128xf32> to vector<8xf32>
    %18 = vector.shape_cast %17 : vector<8xf32> to vector<8x1xf32>
    %cst_8 = arith.constant 3.125000e-02 : f32
    %19 = vector.broadcast %cst_8 : f32 to vector<8x1xf32>
    %20 = arith.mulf %18, %19 : vector<8x1xf32>
    %21 = vector.broadcast %20 : vector<8x1xf32> to vector<8x128xf32>
    %22 = arith.subf %16, %21 : vector<8x128xf32>
    %cst_9 = arith.constant 0.000000e+00 : f32
    %23 = vector.shape_cast %11 : vector<1x128xi1> to vector<1x128xi1>
    %24 = vector.broadcast %23 : vector<1x128xi1> to vector<8x128xi1>
    %25 = vector.broadcast %cst_9 : f32 to vector<8x128xf32>
    %26 = arith.select %24, %22, %25 : vector<8x128xi1>, vector<8x128xf32>
    %27 = arith.mulf %26, %26 : vector<8x128xf32>
    %cst_10 = arith.constant dense<0.000000e+00> : vector<8xf32>
    %28 = vector.multi_reduction <add>, %27, %cst_10 [1] : vector<8x128xf32> to vector<8xf32>
    %29 = vector.shape_cast %28 : vector<8xf32> to vector<8x1xf32>
    %cst_11 = arith.constant 3.125000e-02 : f32
    %30 = vector.broadcast %cst_11 : f32 to vector<8x1xf32>
    %31 = arith.mulf %29, %30 : vector<8x1xf32>
    %cst_12 = arith.constant 9.99999974E-6 : f32
    %32 = vector.broadcast %cst_12 : f32 to vector<8x1xf32>
    %33 = arith.addf %31, %32 : vector<8x1xf32>
    %34 = math.rsqrt %33 : vector<8x1xf32>
    %35 = vector.broadcast %34 : vector<8x1xf32> to vector<8x128xf32>
    %36 = arith.mulf %26, %35 : vector<8x128xf32>
    %37 = vector.broadcast %2 : vector<1x128xf32> to vector<8x128xf32>
    %38 = arith.mulf %36, %37 : vector<8x128xf32>
    %39 = vector.broadcast %3 : vector<1x128xf32> to vector<8x128xf32>
    %40 = arith.addf %38, %39 : vector<8x128xf32>
    %cst_13 = arith.constant 0.000000e+00 : f32
    %41 = vector.broadcast %cst_13 : f32 to vector<8x128xf32>
    %42 = arith.maximumf %40, %41 : vector<8x128xf32>
    %43 = arith.truncf %42 : vector<8x128xf32> to vector<8x128xbf16>
    %cst_14 = arith.constant dense<0.000000e+00> : vector<8x128xf32>
    %44 = tpu.matmul %43, %8, %cst_14 {dimension_numbers = #tpu.dot_dimension_numbers<[1], [0], [0], [1], [0, 0, 1, 1], [], []>} : vector<8x128xbf16>, vector<128x128xbf16>, vector<8x128xf32> -> vector<8x128xf32>
    %45 = vector.broadcast %4 : vector<1x128xf32> to vector<8x128xf32>
    %46 = arith.addf %44, %45 : vector<8x128xf32>
    %cst_15 = arith.constant dense<0.000000e+00> : vector<8xf32>
    %47 = vector.multi_reduction <add>, %46, %cst_15 [1] : vector<8x128xf32> to vector<8xf32>
    %48 = vector.shape_cast %47 : vector<8xf32> to vector<8x1xf32>
    %cst_16 = arith.constant 3.125000e-02 : f32
    %49 = vector.broadcast %cst_16 : f32 to vector<8x1xf32>
    %50 = arith.mulf %48, %49 : vector<8x1xf32>
    %51 = vector.broadcast %50 : vector<8x1xf32> to vector<8x128xf32>
    %52 = arith.subf %46, %51 : vector<8x128xf32>
    %cst_17 = arith.constant 0.000000e+00 : f32
    %53 = vector.shape_cast %11 : vector<1x128xi1> to vector<1x128xi1>
    %54 = vector.broadcast %53 : vector<1x128xi1> to vector<8x128xi1>
    %55 = vector.broadcast %cst_17 : f32 to vector<8x128xf32>
    %56 = arith.select %54, %52, %55 : vector<8x128xi1>, vector<8x128xf32>
    %57 = arith.mulf %56, %56 : vector<8x128xf32>
    %cst_18 = arith.constant dense<0.000000e+00> : vector<8xf32>
    %58 = vector.multi_reduction <add>, %57, %cst_18 [1] : vector<8x128xf32> to vector<8xf32>
    %59 = vector.shape_cast %58 : vector<8xf32> to vector<8x1xf32>
    %cst_19 = arith.constant 3.125000e-02 : f32
    %60 = vector.broadcast %cst_19 : f32 to vector<8x1xf32>
    %61 = arith.mulf %59, %60 : vector<8x1xf32>
    %cst_20 = arith.constant 9.99999974E-6 : f32
    %62 = vector.broadcast %cst_20 : f32 to vector<8x1xf32>
    %63 = arith.addf %61, %62 : vector<8x1xf32>
    %64 = math.rsqrt %63 : vector<8x1xf32>
    %65 = vector.broadcast %64 : vector<8x1xf32> to vector<8x128xf32>
    %66 = arith.mulf %56, %65 : vector<8x128xf32>
    %67 = vector.broadcast %5 : vector<1x128xf32> to vector<8x128xf32>
    %68 = arith.mulf %66, %67 : vector<8x128xf32>
    %69 = vector.broadcast %6 : vector<1x128xf32> to vector<8x128xf32>
    %70 = arith.addf %68, %69 : vector<8x128xf32>
    %71 = arith.addf %12, %70 : vector<8x128xf32>
    %c0_21 = arith.constant 0 : index
    %c0_22 = arith.constant 0 : index
    %72 = vector.load %arg5[%c0_21, %c0_22] : memref<8x128xf32, #tpu.memory_space<vmem>>, vector<8x128xf32>
    tpu.vector_store %arg5[%c0_21, %c0_22], %71 {strides = array<i32>} : memref<8x128xf32, #tpu.memory_space<vmem>>, vector<8x128xf32>,
    return
  }
  func.func @transform_0(%arg0: i32) -> (i32, i32) {
    %c0_i32 = arith.constant 0 : i32
    %c0_i32_0 = arith.constant 0 : i32
    return %arg0, %c0_i32 : i32, i32
  }
  func.func @transform_1(%arg0: i32) -> (i32, i32) {
    %c0_i32 = arith.constant 0 : i32
    %c0_i32_0 = arith.constant 0 : i32
    %c0_i32_1 = arith.constant 0 : i32
    return %c0_i32, %c0_i32_0 : i32, i32
  }
  func.func @transform_2(%arg0: i32) -> (i32, i32) {
    %c0_i32 = arith.constant 0 : i32
    %c0_i32_0 = arith.constant 0 : i32
    %c0_i32_1 = arith.constant 0 : i32
    return %c0_i32, %c0_i32_0 : i32, i32
  }
  func.func @transform_3(%arg0: i32) -> (i32, i32) {
    %c0_i32 = arith.constant 0 : i32
    %c0_i32_0 = arith.constant 0 : i32
    %c0_i32_1 = arith.constant 0 : i32
    return %c0_i32, %c0_i32_0 : i32, i32
  }
  func.func @transform_4(%arg0: i32) -> (i32, i32) {
    %c0_i32 = arith.constant 0 : i32
    %c0_i32_0 = arith.constant 0 : i32
    return %arg0, %c0_i32 : i32, i32
  }
}

</mosaic_0001>

<bundles_post_ra>
// kernel: _bronet_call.1
= control target key start
LH: loop header
LB: loop body
LE: loop exit
PB: predicated region body
PF: predicated region fallthrough
CT: control target
= control target key end

     0   :  { %9 = vsyncpa [#allocation3], 0  ;;  %s623_s0 = inlined_call_operand.vmem [shape: f32[8,128], index: 0, kind: input, shape index: {}]   ;;  %s624_s1 = inlined_call_operand.hbm [shape: bf16[128,128], index: 1, kind: input, shape index: {}]   ;;  %s625_s2 = inlined_call_operand.hbm [shape: bf16[128,128], index: 2, kind: input, shape index: {}]   ;;  %s626_s3 = inlined_call_operand.vmem [shape: f32[8,128], index: 3, kind: input, shape index: {}]   ;;  %s627_s4 = inlined_call_operand.hbm [shape: f32[8,128], index: 4, kind: output, shape index: {}]  }
   0x1   :  { %10 = vsyncpa [#allocation6], 0 }
   0x2   :  { %11 = vsyncpa [#allocation4], 0  ;;  %s508_s15 = smov [#allocation2]   ;;  %s436_s19 = scalar_lea.hbm %s624_s1, 1024 }
   0x3   :  { %s19_s16 = sshll.u32 %s508_s15, 4  ;;  %p437_p0 = scmp.ne.s32.totalorder %s624_s1, %s436_s19  ;;  %s20_s16 = int_to_ptr.vmem [resolvable:$true] %s19_s16 }
   0x4   :  { %p440_p1 = scmp.lt.u32.totalorder %s436_s19, %s624_s1 }
   0x6   :  { %p442_p2 = pnand %p440_p1, %p437_p0 }
   0x8   :  { %445 = shalt.err (!%p442_p2)
}
   0x9   :  { %s446_s24 = scalar_lea.vmem %s20_s16, 1024  ;;  %p451_p4 = scmp.lt.s32.totalorder %s20_s16, %s20_s16 }
   0xa   :  { %p447_p3 = scmp.ne.s32.totalorder %s20_s16, %s446_s24  ;;  %p452_p5 = scmp.lt.s32.totalorder %s446_s24, %s446_s24 }
   0xc   :  { %p453_p6 = por %p452_p5, %p451_p4 }
   0xe   :  { %p454_p7 = pnand %p453_p6, %p447_p3 }
  0x10   :  { %457 = shalt.err (!%p454_p7)
}
  0x11   :  { %s509_s25 = smov 64   ;;  %s510_s26 = smov 4  }
  0x12   :  { %25 = dma.hbm_to_vmem [thread:$0]  %s624_s1, 1024, %s20_s16, [#allocation3], %s509_s25, %s509_s25, %s510_s26  }
  0x13   :  { %s511_s29 = smov [#allocation5]   ;;  %s458_s7 = scalar_lea.hbm %s625_s2, 1024 }
  0x14   :  { %s31_s30 = sshll.u32 %s511_s29, 4  ;;  %p459_p8 = scmp.ne.s32.totalorder %s625_s2, %s458_s7  ;;  %s32_s30 = int_to_ptr.vmem [resolvable:$true] %s31_s30 }
  0x15   :  { %p462_p9 = scmp.lt.u32.totalorder %s458_s7, %s625_s2 }
  0x17   :  { %p464_p10 = pnand %p462_p9, %p459_p8 }
  0x19   :  { %467 = shalt.err (!%p464_p10)
}
  0x1a   :  { %s468_s12 = scalar_lea.vmem %s32_s30, 1024  ;;  %p473_p12 = scmp.lt.s32.totalorder %s32_s30, %s32_s30 }
  0x1b   :  { %p469_p11 = scmp.ne.s32.totalorder %s32_s30, %s468_s12  ;;  %p474_p13 = scmp.lt.s32.totalorder %s468_s12, %s468_s12 }
  0x1d   :  { %p475_p0 = por %p474_p13, %p473_p12 }
  0x1f   :  { %p476_p1 = pnand %p475_p0, %p469_p11 }
  0x21   :  { %479 = shalt.err (!%p476_p1)
}
  0x22   :  { %37 = dma.hbm_to_vmem [thread:$0]  %s625_s2, 1024, %s32_s30, [#allocation6], %s509_s25, %s509_s25, %s510_s26  }
  0x23   :  { %502 = dma.done.wait [#allocation3], 1024  }
  0x24   :  { %503 = vsyncadd [#allocation3], 4294966272 }
  0x25   :  { %504 = dma.done.wait [#allocation6], 1024  }
  0x26   :  { %505 = vsyncadd [#allocation6], 4294966272  ;;  %v512_v0 = vmov 0.0   ;;  %vm513_vm0 = vmmov 0   ;;  %v416_v1 = vld [vmem:[#allocation2] sm:$0xff]   ;;  %v417_v2 = vld [vmem:[#allocation2 + $0x8] sm:$0xff]   ;;  %v80_v11 = vlaneseq }
  0x27   :  { %369 = vmatprep.subr.bf16.mxu0 %v512_v0  ;;  %385 = vmatprep.mubr.msk.bf16.mxu0 %vm513_vm0, %v512_v0  ;;  %v418_v3 = vld [vmem:[#allocation2 + $0x10] sm:$0xff]   ;;  %v419_v4 = vld [vmem:[#allocation2 + $0x18] sm:$0xff]   ;;  %v420_v5 = vld [vmem:[#allocation2 + $0x20] sm:$0xff]  }
  0x28   :  { %389 = vmatprep.subr.bf16.mxu1 %v512_v0  ;;  %405 = vmatprep.mubr.msk.bf16.mxu1 %vm513_vm0, %v512_v0  ;;  %v421_v6 = vld [vmem:[#allocation2 + $0x28] sm:$0xff]   ;;  %v422_v7 = vld [vmem:[#allocation2 + $0x30] sm:$0xff]   ;;  %v423_v8 = vld [vmem:[#allocation2 + $0x38] sm:$0xff]   ;;  %v582_v12 = vshrl.u32 %v80_v11, 7  ;;  %v81_v23 = vand.u32 127, %v80_v11 }
  0x29   :  { %370 = vmatpush3.bf16.msra.mxu0 %v416_v1  ;;  %v577_v9 = vld [vmem:[%s623_s0] sm:$0xff]  ;;  %v424_v21 = vld [vmem:[#allocation5] sm:$0xff]   ;;  %v425_v22 = vld [vmem:[#allocation5 + $0x8] sm:$0xff]   ;;  %s514_s0 = smov [#allocation7]  }
  0x2a   :  { %371 = vmatprep.subr.bf16.mxu0 %v512_v0  ;;  %v84_v10 = vpack.c.bf16 %v577_v9, %v577_v9  ;;  %v87_v13 = vsub.s32 0, %v582_v12  ;;  %v588_v14 = vld [vmem:[%s626_s3] sm:$0xff]  ;;  %390 = vmatpush3.bf16.msra.mxu1 %v424_v21  ;;  %vm82_vm1 = vcmp.lt.s32.totalorder %v81_v23, 32  ;;  %v427_v30 = vld [vmem:[#allocation5 + $0x18] sm:$0xff]   ;;  %v428_v31 = vld [vmem:[#allocation5 + $0x20] sm:$0xff]   ;;  %v193_v38 = vsub.s32 1, %v582_v12 }
  0x2b   :  { %391 = vmatprep.subr.bf16.mxu1 %v512_v0  ;;  %v426_v29 = vld [vmem:[#allocation5 + $0x10] sm:$0xff]   ;;  %v429_v32 = vld [vmem:[#allocation5 + $0x28] sm:$0xff]   ;;  %v431_v34 = vld [vmem:[#allocation5 + $0x38] sm:$0xff]   ;;  %v198_v39 = vsub.s32 2, %v582_v12  ;;  %v205_v48 = vsub.s32 3, %v582_v12  ;;  %v309_v63 = vsub.s32 4, %v582_v12 }
  0x2c   :  { %v88_v15 = vrot.slane %v588_v14, %v87_v13  ;;  %v430_v33 = vld [vmem:[#allocation5 + $0x30] sm:$0xff]   ;;  %v194_v40 = vrot.slane %v588_v14, %v193_v38  ;;  %s325_s3 = sshll.u32 %s514_s0, 4  ;;  %s326_s3 = int_to_ptr.vmem [resolvable:$true] %s325_s3 }
  0x2d   :  { %372 = vmatpush3.bf16.msra.mxu0 %v417_v2  ;;  %v199_v43 = vrot.slane %v588_v14, %v198_v39  ;;  %v206_v49 = vrot.slane %v588_v14, %v205_v48  ;;  %v310_v1 = vrot.slane %v588_v14, %v309_v63  ;;  %s480_s17 = scalar_lea.vmem %s326_s3, 128  ;;  %p485_p3 = scmp.lt.s32.totalorder %s326_s3, %s326_s3 }
  0x2e   :  { %373 = vmatprep.subr.bf16.mxu0 %v512_v0  ;;  %392 = vmatpush3.bf16.msra.mxu1 %v425_v22  ;;  %p481_p2 = scmp.ne.s32.totalorder %s326_s3, %s480_s17  ;;  %p486_p4 = scmp.lt.s32.totalorder %s480_s17, %s480_s17 }
  0x2f   :  { %393 = vmatprep.subr.bf16.mxu1 %v512_v0 }
  0x30   :  { %p487_p5 = por %p486_p4, %p485_p3 }
  0x31   :  { %374 = vmatpush3.bf16.msra.mxu0 %v418_v3 }
  0x32   :  { %375 = vmatprep.subr.bf16.mxu0 %v512_v0  ;;  %394 = vmatpush3.bf16.msra.mxu1 %v426_v29  ;;  %p488_p6 = pnand %p487_p5, %p481_p2 }
  0x33   :  { %395 = vmatprep.subr.bf16.mxu1 %v512_v0 }
  0x35   :  { %376 = vmatpush3.bf16.msra.mxu0 %v419_v4 }
  0x36   :  { %377 = vmatprep.subr.bf16.mxu0 %v512_v0  ;;  %396 = vmatpush3.bf16.msra.mxu1 %v427_v30 }
  0x37   :  { %397 = vmatprep.subr.bf16.mxu1 %v512_v0 }
  0x39   :  { %378 = vmatpush3.bf16.msra.mxu0 %v420_v5 }
  0x3a   :  { %379 = vmatprep.subr.bf16.mxu0 %v512_v0  ;;  %398 = vmatpush3.bf16.msra.mxu1 %v428_v31 }
  0x3b   :  { %399 = vmatprep.subr.bf16.mxu1 %v512_v0 }
  0x3d   :  { %380 = vmatpush3.bf16.msra.mxu0 %v421_v6 }
  0x3e   :  { %381 = vmatprep.subr.bf16.mxu0 %v512_v0  ;;  %400 = vmatpush3.bf16.msra.mxu1 %v429_v32 }
  0x3f   :  { %401 = vmatprep.subr.bf16.mxu1 %v512_v0 }
  0x41   :  { %382 = vmatpush3.bf16.msra.mxu0 %v422_v7 }
  0x42   :  { %383 = vmatprep.subr.bf16.mxu0 %v512_v0  ;;  %402 = vmatpush3.bf16.msra.mxu1 %v430_v33 }
  0x43   :  { %403 = vmatprep.subr.bf16.mxu1 %v512_v0  ;;  %v314_v0 = vsub.s32 5, %v582_v12 }
  0x45   :  { %384 = vmatpush3.bf16.msra.mxu0 %v423_v8  ;;  %v315_v4 = vrot.slane %v588_v14, %v314_v0 }
  0x46   :  { %404 = vmatpush3.bf16.msra.mxu1 %v431_v34 }
  0x48   :  { %386 = vmatmul.mubr.bf16.vlgmr.msra.gmra.mrb[0].mxu0 %v84_v10 }
 0x11b   :  { %v171_v16 = vpop.f32.mrb[0].mxu0 }
 0x11c   :  { %v172_v17 = vadd.f32 %v171_v16, %v88_v15  ;;  %v387_v18 = vpop.f32.mrb[1].mxu0 }
 0x11d   :  { %v174_v19 = vpop.f32.mrb[2].mxu0 }
 0x11e   :  { %v388_v20 = vpop.f32.mrb[3].mxu0  ;;  %177 = vadd.xlane.f32.xlu0 %v172_v17 }
 0x1ab   :  { %v178_v24 = vpop.xlane.xlu0 %177 }
 0x1ac   :  { %v179_v25 = vmul.f32 0.03125, %v178_v24 }
 0x1ae   :  { %v180_v26 = vsub.f32 %v172_v17, %v179_v25 }
 0x1b0   :  { %v183_v27 = vsel %vm82_vm1, %v180_v26, 0.0 }
 0x1b1   :  { %v184_v28 = vmul.f32 %v183_v27, %v183_v27 }
 0x1b3   :  { %185 = vadd.xlane.f32.xlu0 %v184_v28 }
 0x240   :  { %v186_v35 = vpop.xlane.xlu0 %185 }
 0x241   :  { %v187_v36 = vmul.f32 0.03125, %v186_v35 }
 0x243   :  { %v188_v37 = vadd.f32 1e-05, %v187_v36 }
 0x245   :  { %432 = vrsqrt.f32 %v188_v37 }
 0x24f   :  { %v433_v41 = vpop.eup %432 }
 0x250   :  { %v190_v42 = vmul.f32 %v433_v41, %v183_v27 }
 0x252   :  { %v195_v44 = vmul.f32 %v194_v40, %v190_v42 }
 0x254   :  { %v200_v45 = vadd.f32 %v199_v43, %v195_v44 }
 0x256   :  { %v201_v46 = vmax.f32 %v200_v45, 0.0 }
 0x258   :  { %v202_v47 = vpack.c.bf16 %v201_v46, %v201_v46 }
 0x25a   :  { %406 = vmatmul.mubr.bf16.vlgmr.msra.gmra.mrb[0].mxu1 %v202_v47 }
 0x32d   :  { %v289_v50 = vpop.f32.mrb[0].mxu1 }
 0x32e   :  { %v290_v51 = vadd.f32 %v289_v50, %v206_v49  ;;  %v407_v52 = vpop.f32.mrb[1].mxu1 }
 0x32f   :  { %v292_v53 = vpop.f32.mrb[2].mxu1 }
 0x330   :  { %295 = vadd.xlane.f32.xlu1 %v290_v51  ;;  %v408_v54 = vpop.f32.mrb[3].mxu1 }
 0x3bd   :  { %v296_v55 = vpop.xlane.xlu1 %295 }
 0x3be   :  { %v297_v56 = vmul.f32 0.03125, %v296_v55 }
 0x3c0   :  { %v298_v57 = vsub.f32 %v290_v51, %v297_v56 }
 0x3c2   :  { %v299_v58 = vsel %vm82_vm1, %v298_v57, 0.0 }
 0x3c3   :  { %v300_v59 = vmul.f32 %v299_v58, %v299_v58 }
 0x3c5   :  { %301 = vadd.xlane.f32.xlu1 %v300_v59 }
 0x452   :  { %v302_v60 = vpop.xlane.xlu1 %301 }
 0x453   :  { %v303_v61 = vmul.f32 0.03125, %v302_v60 }
 0x455   :  { %v304_v62 = vadd.f32 1e-05, %v303_v61 }
 0x457   :  { %434 = vrsqrt.f32 %v304_v62 }
 0x461   :  { %v435_v2 = vpop.eup %434 }
 0x462   :  { %v306_v3 = vmul.f32 %v435_v2, %v299_v58 }
 0x464   :  { %v311_v5 = vmul.f32 %v310_v1, %v306_v3 }
 0x466   :  { %v316_v6 = vadd.f32 %v315_v4, %v311_v5 }
 0x468   :  { %v317_v7 = vadd.f32 %v316_v6, %v577_v9 }
 0x46a   :  { %318 = vst [vmem:[#allocation7] sm:$0xff] %v317_v7 }
 0x46b   :  { %491 = shalt.err (!%p488_p6)
}
 0x46c   :  { %s492_s20 = scalar_lea.hbm %s627_s4, 128 }
 0x46d   :  { %p493_p7 = scmp.ne.s32.totalorder %s627_s4, %s492_s20  ;;  %p496_p8 = scmp.lt.u32.totalorder %s492_s20, %s627_s4 }
 0x46f   :  { %p498_p9 = pnand %p496_p8, %p493_p7 }
 0x471   :  { %501 = shalt.err (!%p498_p9)
}
 0x472   :  { %328 = dma.vmem_to_hbm [thread:$0]  %s326_s3, 128, %s627_s4, [#allocation4]  }
 0x473   :  { %506 = dma.done.wait [#allocation4], 128  }
 0x474   :  { %507 = vsyncadd [#allocation4], 4294967168 }
 0x475   :  { %332 = vsyncpa [#allocation3], 1 }
 0x476   :  { %333 = vsyncpa [#allocation6], 1 }
 0x477   :  { %334 = vsyncpa [#allocation4], 1 }

// kernel: _bronet_call.1
= control target key start
LH: loop header
LB: loop body
LE: loop exit
PB: predicated region body
PF: predicated region fallthrough
CT: control target
= control target key end

     0   :  { %9 = vsyncpa [#allocation3], 0  ;;  %s623_s0 = inlined_call_operand.vmem [shape: f32[8,128], index: 0, kind: input, shape index: {}]   ;;  %s624_s1 = inlined_call_operand.hbm [shape: bf16[128,128], index: 1, kind: input, shape index: {}]   ;;  %s625_s2 = inlined_call_operand.hbm [shape: bf16[128,128], index: 2, kind: input, shape index: {}]   ;;  %s626_s3 = inlined_call_operand.vmem [shape: f32[8,128], index: 3, kind: input, shape index: {}]   ;;  %s627_s4 = inlined_call_operand.hbm [shape: f32[8,128], index: 4, kind: output, shape index: {}]  }
   0x1   :  { %10 = vsyncpa [#allocation6], 0 }
   0x2   :  { %11 = vsyncpa [#allocation4], 0  ;;  %s508_s15 = smov [#allocation2]   ;;  %s436_s19 = scalar_lea.hbm %s624_s1, 1024 }
   0x3   :  { %s19_s16 = sshll.u32 %s508_s15, 4  ;;  %p437_p0 = scmp.ne.s32.totalorder %s624_s1, %s436_s19  ;;  %s20_s16 = int_to_ptr.vmem [resolvable:$true] %s19_s16 }
   0x4   :  { %p440_p1 = scmp.lt.u32.totalorder %s436_s19, %s624_s1 }
   0x6   :  { %p442_p2 = pnand %p440_p1, %p437_p0 }
   0x8   :  { %445 = shalt.err (!%p442_p2)
}
   0x9   :  { %s446_s24 = scalar_lea.vmem %s20_s16, 1024  ;;  %p451_p4 = scmp.lt.s32.totalorder %s20_s16, %s20_s16 }
   0xa   :  { %p447_p3 = scmp.ne.s32.totalorder %s20_s16, %s446_s24  ;;  %p452_p5 = scmp.lt.s32.totalorder %s446_s24, %s446_s24 }
   0xc   :  { %p453_p6 = por %p452_p5, %p451_p4 }
   0xe   :  { %p454_p7 = pnand %p453_p6, %p447_p3 }
  0x10   :  { %457 = shalt.err (!%p454_p7)
}
  0x11   :  { %s509_s25 = smov 64   ;;  %s510_s26 = smov 4  }
  0x12   :  { %25 = dma.hbm_to_vmem [thread:$0]  %s624_s1, 1024, %s20_s16, [#allocation3], %s509_s25, %s509_s25, %s510_s26  }
  0x13   :  { %s511_s29 = smov [#allocation5]   ;;  %s458_s7 = scalar_lea.hbm %s625_s2, 1024 }
  0x14   :  { %s31_s30 = sshll.u32 %s511_s29, 4  ;;  %p459_p8 = scmp.ne.s32.totalorder %s625_s2, %s458_s7  ;;  %s32_s30 = int_to_ptr.vmem [resolvable:$true] %s31_s30 }
  0x15   :  { %p462_p9 = scmp.lt.u32.totalorder %s458_s7, %s625_s2 }
  0x17   :  { %p464_p10 = pnand %p462_p9, %p459_p8 }
  0x19   :  { %467 = shalt.err (!%p464_p10)
}
  0x1a   :  { %s468_s12 = scalar_lea.vmem %s32_s30, 1024  ;;  %p473_p12 = scmp.lt.s32.totalorder %s32_s30, %s32_s30 }
  0x1b   :  { %p469_p11 = scmp.ne.s32.totalorder %s32_s30, %s468_s12  ;;  %p474_p13 = scmp.lt.s32.totalorder %s468_s12, %s468_s12 }
  0x1d   :  { %p475_p0 = por %p474_p13, %p473_p12 }
  0x1f   :  { %p476_p1 = pnand %p475_p0, %p469_p11 }
  0x21   :  { %479 = shalt.err (!%p476_p1)
}
  0x22   :  { %37 = dma.hbm_to_vmem [thread:$0]  %s625_s2, 1024, %s32_s30, [#allocation6], %s509_s25, %s509_s25, %s510_s26  }
  0x23   :  { %502 = dma.done.wait [#allocation3], 1024  }
  0x24   :  { %503 = vsyncadd [#allocation3], 4294966272 }
  0x25   :  { %504 = dma.done.wait [#allocation6], 1024  }
  0x26   :  { %505 = vsyncadd [#allocation6], 4294966272  ;;  %v512_v0 = vmov 0.0   ;;  %vm513_vm0 = vmmov 0   ;;  %v416_v1 = vld [vmem:[#allocation2] sm:$0xff]   ;;  %v417_v2 = vld [vmem:[#allocation2 + $0x8] sm:$0xff]   ;;  %v80_v11 = vlaneseq }
  0x27   :  { %369 = vmatprep.subr.bf16.mxu0 %v512_v0  ;;  %385 = vmatprep.mubr.msk.bf16.mxu0 %vm513_vm0, %v512_v0  ;;  %v418_v3 = vld [vmem:[#allocation2 + $0x10] sm:$0xff]   ;;  %v419_v4 = vld [vmem:[#allocation2 + $0x18] sm:$0xff]   ;;  %v420_v5 = vld [vmem:[#allocation2 + $0x20] sm:$0xff]  }
  0x28   :  { %389 = vmatprep.subr.bf16.mxu1 %v512_v0  ;;  %405 = vmatprep.mubr.msk.bf16.mxu1 %vm513_vm0, %v512_v0  ;;  %v421_v6 = vld [vmem:[#allocation2 + $0x28] sm:$0xff]   ;;  %v422_v7 = vld [vmem:[#allocation2 + $0x30] sm:$0xff]   ;;  %v423_v8 = vld [vmem:[#allocation2 + $0x38] sm:$0xff]   ;;  %v582_v12 = vshrl.u32 %v80_v11, 7  ;;  %v81_v23 = vand.u32 127, %v80_v11 }
  0x29   :  { %370 = vmatpush3.bf16.msra.mxu0 %v416_v1  ;;  %v577_v9 = vld [vmem:[%s623_s0] sm:$0xff]  ;;  %v424_v21 = vld [vmem:[#allocation5] sm:$0xff]   ;;  %v425_v22 = vld [vmem:[#allocation5 + $0x8] sm:$0xff]   ;;  %s514_s0 = smov [#allocation7]  }
  0x2a   :  { %371 = vmatprep.subr.bf16.mxu0 %v512_v0  ;;  %v84_v10 = vpack.c.bf16 %v577_v9, %v577_v9  ;;  %v87_v13 = vsub.s32 0, %v582_v12  ;;  %v588_v14 = vld [vmem:[%s626_s3] sm:$0xff]  ;;  %390 = vmatpush3.bf16.msra.mxu1 %v424_v21  ;;  %vm82_vm1 = vcmp.lt.s32.totalorder %v81_v23, 32  ;;  %v427_v30 = vld [vmem:[#allocation5 + $0x18] sm:$0xff]   ;;  %v428_v31 = vld [vmem:[#allocation5 + $0x20] sm:$0xff]   ;;  %v193_v38 = vsub.s32 1, %v582_v12 }
  0x2b   :  { %391 = vmatprep.subr.bf16.mxu1 %v512_v0  ;;  %v426_v29 = vld [vmem:[#allocation5 + $0x10] sm:$0xff]   ;;  %v429_v32 = vld [vmem:[#allocation5 + $0x28] sm:$0xff]   ;;  %v431_v34 = vld [vmem:[#allocation5 + $0x38] sm:$0xff]   ;;  %v198_v39 = vsub.s32 2, %v582_v12  ;;  %v205_v48 = vsub.s32 3, %v582_v12  ;;  %v309_v63 = vsub.s32 4, %v582_v12 }
  0x2c   :  { %v88_v15 = vrot.slane %v588_v14, %v87_v13  ;;  %v430_v33 = vld [vmem:[#allocation5 + $0x30] sm:$0xff]   ;;  %v194_v40 = vrot.slane %v588_v14, %v193_v38  ;;  %s325_s3 = sshll.u32 %s514_s0, 4  ;;  %s326_s3 = int_to_ptr.vmem [resolvable:$true] %s325_s3 }
  0x2d   :  { %372 = vmatpush3.bf16.msra.mxu0 %v417_v2  ;;  %v199_v43 = vrot.slane %v588_v14, %v198_v39  ;;  %v206_v49 = vrot.slane %v588_v14, %v205_v48  ;;  %v310_v1 = vrot.slane %v588_v14, %v309_v63  ;;  %s480_s17 = scalar_lea.vmem %s326_s3, 128  ;;  %p485_p3 = scmp.lt.s32.totalorder %s326_s3, %s326_s3 }
  0x2e   :  { %373 = vmatprep.subr.bf16.mxu0 %v512_v0  ;;  %392 = vmatpush3.bf16.msra.mxu1 %v425_v22  ;;  %p481_p2 = scmp.ne.s32.totalorder %s326_s3, %s480_s17  ;;  %p486_p4 = scmp.lt.s32.totalorder %s480_s17, %s480_s17 }
  0x2f   :  { %393 = vmatprep.subr.bf16.mxu1 %v512_v0 }
  0x30   :  { %p487_p5 = por %p486_p4, %p485_p3 }
  0x31   :  { %374 = vmatpush3.bf16.msra.mxu0 %v418_v3 }
  0x32   :  { %375 = vmatprep.subr.bf16.mxu0 %v512_v0  ;;  %394 = vmatpush3.bf16.msra.mxu1 %v426_v29  ;;  %p488_p6 = pnand %p487_p5, %p481_p2 }
  0x33   :  { %395 = vmatprep.subr.bf16.mxu1 %v512_v0 }
  0x35   :  { %376 = vmatpush3.bf16.msra.mxu0 %v419_v4 }
  0x36   :  { %377 = vmatprep.subr.bf16.mxu0 %v512_v0  ;;  %396 = vmatpush3.bf16.msra.mxu1 %v427_v30 }
  0x37   :  { %397 = vmatprep.subr.bf16.mxu1 %v512_v0 }
  0x39   :  { %378 = vmatpush3.bf16.msra.mxu0 %v420_v5 }
  0x3a   :  { %379 = vmatprep.subr.bf16.mxu0 %v512_v0  ;;  %398 = vmatpush3.bf16.msra.mxu1 %v428_v31 }
  0x3b   :  { %399 = vmatprep.subr.bf16.mxu1 %v512_v0 }
  0x3d   :  { %380 = vmatpush3.bf16.msra.mxu0 %v421_v6 }
  0x3e   :  { %381 = vmatprep.subr.bf16.mxu0 %v512_v0  ;;  %400 = vmatpush3.bf16.msra.mxu1 %v429_v32 }
  0x3f   :  { %401 = vmatprep.subr.bf16.mxu1 %v512_v0 }
  0x41   :  { %382 = vmatpush3.bf16.msra.mxu0 %v422_v7 }
  0x42   :  { %383 = vmatprep.subr.bf16.mxu0 %v512_v0  ;;  %402 = vmatpush3.bf16.msra.mxu1 %v430_v33 }
  0x43   :  { %403 = vmatprep.subr.bf16.mxu1 %v512_v0  ;;  %v314_v0 = vsub.s32 5, %v582_v12 }
  0x45   :  { %384 = vmatpush3.bf16.msra.mxu0 %v423_v8  ;;  %v315_v4 = vrot.slane %v588_v14, %v314_v0 }
  0x46   :  { %404 = vmatpush3.bf16.msra.mxu1 %v431_v34 }
  0x48   :  { %386 = vmatmul.mubr.bf16.vlgmr.msra.gmra.mrb[0].mxu0 %v84_v10 }
 0x11b   :  { %v171_v16 = vpop.f32.mrb[0].mxu0 }
 0x11c   :  { %v172_v17 = vadd.f32 %v171_v16, %v88_v15  ;;  %v387_v18 = vpop.f32.mrb[1].mxu0 }
 0x11d   :  { %v174_v19 = vpop.f32.mrb[2].mxu0 }
 0x11e   :  { %v388_v20 = vpop.f32.mrb[3].mxu0  ;;  %177 = vadd.xlane.f32.xlu0 %v172_v17 }
 0x1ab   :  { %v178_v24 = vpop.xlane.xlu0 %177 }
 0x1ac   :  { %v179_v25 = vmul.f32 0.03125, %v178_v24 }
 0x1ae   :  { %v180_v26 = vsub.f32 %v172_v17, %v179_v25 }
 0x1b0   :  { %v183_v27 = vsel %vm82_vm1, %v180_v26, 0.0 }
 0x1b1   :  { %v184_v28 = vmul.f32 %v183_v27, %v183_v27 }
 0x1b3   :  { %185 = vadd.xlane.f32.xlu0 %v184_v28 }
 0x240   :  { %v186_v35 = vpop.xlane.xlu0 %185 }
 0x241   :  { %v187_v36 = vmul.f32 0.03125, %v186_v35 }
 0x243   :  { %v188_v37 = vadd.f32 1e-05, %v187_v36 }
 0x245   :  { %432 = vrsqrt.f32 %v188_v37 }
 0x24f   :  { %v433_v41 = vpop.eup %432 }
 0x250   :  { %v190_v42 = vmul.f32 %v433_v41, %v183_v27 }
 0x252   :  { %v195_v44 = vmul.f32 %v194_v40, %v190_v42 }
 0x254   :  { %v200_v45 = vadd.f32 %v199_v43, %v195_v44 }
 0x256   :  { %v201_v46 = vmax.f32 %v200_v45, 0.0 }
 0x258   :  { %v202_v47 = vpack.c.bf16 %v201_v46, %v201_v46 }
 0x25a   :  { %406 = vmatmul.mubr.bf16.vlgmr.msra.gmra.mrb[0].mxu1 %v202_v47 }
 0x32d   :  { %v289_v50 = vpop.f32.mrb[0].mxu1 }
 0x32e   :  { %v290_v51 = vadd.f32 %v289_v50, %v206_v49  ;;  %v407_v52 = vpop.f32.mrb[1].mxu1 }
 0x32f   :  { %v292_v53 = vpop.f32.mrb[2].mxu1 }
 0x330   :  { %295 = vadd.xlane.f32.xlu1 %v290_v51  ;;  %v408_v54 = vpop.f32.mrb[3].mxu1 }
 0x3bd   :  { %v296_v55 = vpop.xlane.xlu1 %295 }
 0x3be   :  { %v297_v56 = vmul.f32 0.03125, %v296_v55 }
 0x3c0   :  { %v298_v57 = vsub.f32 %v290_v51, %v297_v56 }
 0x3c2   :  { %v299_v58 = vsel %vm82_vm1, %v298_v57, 0.0 }
 0x3c3   :  { %v300_v59 = vmul.f32 %v299_v58, %v299_v58 }
 0x3c5   :  { %301 = vadd.xlane.f32.xlu1 %v300_v59 }
 0x452   :  { %v302_v60 = vpop.xlane.xlu1 %301 }
 0x453   :  { %v303_v61 = vmul.f32 0.03125, %v302_v60 }
 0x455   :  { %v304_v62 = vadd.f32 1e-05, %v303_v61 }
 0x457   :  { %434 = vrsqrt.f32 %v304_v62 }
 0x461   :  { %v435_v2 = vpop.eup %434 }
 0x462   :  { %v306_v3 = vmul.f32 %v435_v2, %v299_v58 }
 0x464   :  { %v311_v5 = vmul.f32 %v310_v1, %v306_v3 }
 0x466   :  { %v316_v6 = vadd.f32 %v315_v4, %v311_v5 }
 0x468   :  { %v317_v7 = vadd.f32 %v316_v6, %v577_v9 }
 0x46a   :  { %318 = vst [vmem:[#allocation7] sm:$0xff] %v317_v7 }
 0x46b   :  { %491 = shalt.err (!%p488_p6)
}
 0x46c   :  { %s492_s20 = scalar_lea.hbm %s627_s4, 128 }
 0x46d   :  { %p493_p7 = scmp.ne.s32.totalorder %s627_s4, %s492_s20  ;;  %p496_p8 = scmp.lt.u32.totalorder %s492_s20, %s627_s4 }
 0x46f   :  { %p498_p9 = pnand %p496_p8, %p493_p7 }
 0x471   :  { %501 = shalt.err (!%p498_p9)
}
 0x472   :  { %328 = dma.vmem_to_hbm [thread:$0]  %s326_s3, 128, %s627_s4, [#allocation4]  }
 0x473   :  { %506 = dma.done.wait [#allocation4], 128  }
 0x474   :  { %507 = vsyncadd [#allocation4], 4294967168 }
 0x475   :  { %332 = vsyncpa [#allocation3], 1 }
 0x476   :  { %333 = vsyncpa [#allocation6], 1 }
 0x477   :  { %334 = vsyncpa [#allocation4], 1 }

</bundles_post_ra>
